<compile_context>
chip_gen: v7x
topology: tpu7x:2x2x1
jax: 0.10.0
libtpu: 0.0.40
codegen_flags: <defaults>
</compile_context>

<pallas_src>
import functools

import jax
import jax.numpy as jnp
from jax import lax
from jax.experimental import pallas as pl
from jax.experimental.pallas import tpu as pltpu


def _mha_kernel(x_ref, w_qkv_ref, b_qkv_ref, wo_ref, bo_ref, o_ref, *,
                num_heads, head_dim):
    D = num_heads * head_dim
    x = x_ref[0]                                               # (L, D)
    L = x.shape[0]

    # Fused QKV projection: one MXU pass with N = 3D. Q comes out pre-scaled
    # (1/sqrt(head_dim) folded into weights/bias in prepare_params).
    qkv = jnp.dot(x, w_qkv_ref[...],
                  preferred_element_type=jnp.float32) + b_qkv_ref[...]
    q = qkv[:, :D]
    k = qkv[:, D:2 * D]
    v = qkv[:, 2 * D:]

    out = jnp.zeros((L, D), jnp.float32)
    for h in range(num_heads):                                 # static unroll over heads
        lo = h * head_dim
        hi = lo + head_dim
        qh = q[:, lo:hi]                                       # (L, Hd)
        kh = k[:, lo:hi]
        vh = v[:, lo:hi]

        # qh @ kh^T without materializing a transpose: contract the last dims.
        s = lax.dot_general(qh, kh, (((1,), (1,)), ((), ())),
                            preferred_element_type=jnp.float32)   # (L, L)

        # Numerically stable softmax; reciprocal goes to the EUP slot.
        m = jnp.max(s, axis=-1, keepdims=True)
        e = jnp.exp(s - m)
        denom = jnp.sum(e, axis=-1, keepdims=True)
        p = e * pl.reciprocal(denom, approx=True)

        ch = jnp.dot(p, vh, preferred_element_type=jnp.float32)   # (L, Hd)

        # Fuse the head-concat into the output projection: accumulate ch @ Wo[lo:hi, :].
        out = out + jnp.dot(ch, wo_ref[lo:hi, :],
                            preferred_element_type=jnp.float32)

    o_ref[0] = (out + bo_ref[...]).astype(o_ref.dtype)


def prepare_params(params, num_heads):
    """One-time fusion / pre-transposition of PyTorch-convention parameters."""
    D = params["wq"].shape[0]
    head_dim = D // num_heads
    scaler = 1.0 / (head_dim ** 0.5)
    # PyTorch nn.Linear weight is (out, in) -> transpose to (in, out), fuse QKV,
    # and fold the attention scale into the Q projection (weights AND bias).
    w_qkv = jnp.concatenate(
        [params["wq"].T * scaler, params["wk"].T, params["wv"].T], axis=1)     # (D, 3D)
    b_qkv = jnp.concatenate(
        [params["bq"] * scaler, params["bk"], params["bv"]]).reshape(1, 3 * D)  # (1, 3D)
    wo = params["wo"].T                                                         # (D, D)
    bo = params["bo"].reshape(1, D)                                             # (1, D)
    return w_qkv, b_qkv, wo, bo


def self_attention_pallas(x, w_qkv, b_qkv, wo, bo, num_heads):
    """x: (B, L, D). Fused/pre-transposed params from prepare_params."""
    B, L, D = x.shape
    head_dim = D // num_heads

    kernel = functools.partial(_mha_kernel, num_heads=num_heads, head_dim=head_dim)

    return pl.pallas_call(
        kernel,
        out_shape=jax.ShapeDtypeStruct((B, L, D), x.dtype),
        grid_spec=pltpu.PrefetchScalarGridSpec(
            num_scalar_prefetch=0,
            grid=(B,),
            in_specs=[
                pl.BlockSpec((1, L, D), lambda b: (b, 0, 0)),    # x (per-batch block)
                pl.BlockSpec((D, 3 * D), lambda b: (0, 0)),      # fused QKV weight
                pl.BlockSpec((1, 3 * D), lambda b: (0, 0)),      # fused QKV bias
                pl.BlockSpec((D, D), lambda b: (0, 0)),          # output-proj weight
                pl.BlockSpec((1, D), lambda b: (0, 0)),          # output-proj bias
            ],
            out_specs=pl.BlockSpec((1, L, D), lambda b: (b, 0, 0)),
        ),
        compiler_params=pltpu.CompilerParams(
            dimension_semantics=("parallel",),
            vmem_limit_bytes=48 * 1024 * 1024,
        ),
    )(x, w_qkv, b_qkv, wo, bo)


def self_attention_ref(x, params, num_heads):
    """Pure-JAX reference mirroring the PyTorch forward exactly."""
    B, L, D = x.shape
    hd = D // num_heads
    scaler = 1.0 / (hd ** 0.5)

    def linear(x, w, b):  # PyTorch convention: w is (out, in)
        return x @ w.T + b

    q = linear(x, params["wq"], params["bq"])
    k = linear(x, params["wk"], params["bk"])
    v = linear(x, params["wv"], params["bv"])
    q = q.reshape(B, L, num_heads, hd).transpose(0, 2, 1, 3)
    k = k.reshape(B, L, num_heads, hd).transpose(0, 2, 1, 3)
    v = v.reshape(B, L, num_heads, hd).transpose(0, 2, 1, 3)
    s = jnp.einsum("bhqd,bhkd->bhqk", q, k) * scaler
    p = jax.nn.softmax(s, axis=-1)
    ctx = jnp.einsum("bhqk,bhkd->bhqd", p, v)
    ctx = ctx.transpose(0, 2, 1, 3).reshape(B, L, D)
    return linear(ctx, params["wo"], params["bo"])


if __name__ == "__main__":
    B, L, D = 2, 8, 32
    num_heads = 4

    key = jax.random.PRNGKey(0)
    keys = jax.random.split(key, 9)

    # Deterministic parameter init (PyTorch nn.Linear convention: (out, in)).
    bound = 1.0 / (D ** 0.5)
    params = {
        "wq": jax.random.uniform(keys[0], (D, D), jnp.float32, -bound, bound),
        "bq": jax.random.uniform(keys[1], (D,), jnp.float32, -bound, bound),
        "wk": jax.random.uniform(keys[2], (D, D), jnp.float32, -bound, bound),
        "bk": jax.random.uniform(keys[3], (D,), jnp.float32, -bound, bound),
        "wv": jax.random.uniform(keys[4], (D, D), jnp.float32, -bound, bound),
        "bv": jax.random.uniform(keys[5], (D,), jnp.float32, -bound, bound),
        "wo": jax.random.uniform(keys[6], (D, D), jnp.float32, -bound, bound),
        "bo": jax.random.uniform(keys[7], (D,), jnp.float32, -bound, bound),
    }
    x = jax.random.normal(keys[8], (B, L, D), jnp.float32)

    # Fuse / pre-transpose once (no per-call HBM transpose pass).
    w_qkv, b_qkv, wo, bo = prepare_params(params, num_heads)

    out = self_attention_pallas(x, w_qkv, b_qkv, wo, bo, num_heads)
    out = jax.block_until_ready(out)

    ref = self_attention_ref(x, params, num_heads)
    assert out.shape == (B, L, D)
    # Slightly loosened tolerance: softmax denominator uses the EUP approximate
    # reciprocal (pl.reciprocal(approx=True)); everything else is f32-exact.
    assert jnp.allclose(out, ref, atol=2e-3, rtol=2e-3), (
        f"max abs err {jnp.max(jnp.abs(out - ref))}")

    print("KERNEL_OK")
</pallas_src>

<mosaic_0001>
module attributes {stable_mosaic.version = 11 : i64} {
  func.func @_mha_kernel(%arg0: i32, %arg1: memref<1x8x32xf32, #tpu.memory_space<vmem>>, %arg2: memref<32x96xf32, #tpu.memory_space<vmem>>, %arg3: memref<1x96xf32, #tpu.memory_space<vmem>>, %arg4: memref<32x32xf32, #tpu.memory_space<vmem>>, %arg5: memref<1x32xf32, #tpu.memory_space<vmem>>, %arg6: memref<1x8x32xf32, #tpu.memory_space<vmem>>) attributes {dimension_semantics = [#tpu.dimension_semantics<parallel>], iteration_bounds = array<i64: 2>, scalar_prefetch = 0 : i64, scratch_operands = 0 : i64, tpu.core_type = #tpu.core_type<tc>, window_params = [{transform_indices = @transform_0, window_bounds = array<i64: 1, 8, 32>}, {pipeline_mode = #tpu.pipeline_mode<synchronous>, transform_indices = @transform_1, window_bounds = array<i64: 32, 96>}, {pipeline_mode = #tpu.pipeline_mode<synchronous>, transform_indices = @transform_2, window_bounds = array<i64: 1, 96>}, {pipeline_mode = #tpu.pipeline_mode<synchronous>, transform_indices = @transform_3, window_bounds = array<i64: 32, 32>}, {pipeline_mode = #tpu.pipeline_mode<synchronous>, transform_indices = @transform_4, window_bounds = array<i64: 1, 32>}, {transform_indices = @transform_5, window_bounds = array<i64: 1, 8, 32>}]} {
    %c0 = arith.constant 0 : index
    %c0_0 = arith.constant 0 : index
    %c0_1 = arith.constant 0 : index
    %0 = vector.load %arg1[%c0, %c0_0, %c0_1] : memref<1x8x32xf32, #tpu.memory_space<vmem>>, vector<1x8x32xf32>
    %1 = vector.shape_cast %0 : vector<1x8x32xf32> to vector<8x32xf32>
    %c0_2 = arith.constant 0 : index
    %c0_3 = arith.constant 0 : index
    %2 = vector.load %arg2[%c0_2, %c0_3] : memref<32x96xf32, #tpu.memory_space<vmem>>, vector<32x96xf32>
    %cst = arith.constant dense<0.000000e+00> : vector<8x96xf32>
    %3 = tpu.matmul %1, %2, %cst {dimension_numbers = #tpu.dot_dimension_numbers<[1], [0], [0], [1], [0, 0, 1, 1], [], []>} : vector<8x32xf32>, vector<32x96xf32>, vector<8x96xf32> -> vector<8x96xf32>
    %c0_4 = arith.constant 0 : index
    %c0_5 = arith.constant 0 : index
    %4 = vector.load %arg3[%c0_4, %c0_5] : memref<1x96xf32, #tpu.memory_space<vmem>>, vector<1x96xf32>
    %5 = vector.broadcast %4 : vector<1x96xf32> to vector<8x96xf32>
    %6 = arith.addf %3, %5 : vector<8x96xf32>
    %7 = vector.extract_strided_slice %6 {offsets = [0, 0], sizes = [8, 32], strides = [1, 1]} : vector<8x96xf32> to vector<8x32xf32>
    %8 = vector.extract_strided_slice %6 {offsets = [0, 32], sizes = [8, 32], strides = [1, 1]} : vector<8x96xf32> to vector<8x32xf32>
    %9 = vector.extract_strided_slice %6 {offsets = [0, 64], sizes = [8, 32], strides = [1, 1]} : vector<8x96xf32> to vector<8x32xf32>
    %cst_6 = arith.constant 0.000000e+00 : f32
    %10 = vector.broadcast %cst_6 : f32 to vector<8x32xf32>
    %11 = vector.extract_strided_slice %7 {offsets = [0, 0], sizes = [8, 8], strides = [1, 1]} : vector<8x32xf32> to vector<8x8xf32>
    %12 = vector.extract_strided_slice %8 {offsets = [0, 0], sizes = [8, 8], strides = [1, 1]} : vector<8x32xf32> to vector<8x8xf32>
    %13 = vector.extract_strided_slice %9 {offsets = [0, 0], sizes = [8, 8], strides = [1, 1]} : vector<8x32xf32> to vector<8x8xf32>
    %cst_7 = arith.constant dense<0.000000e+00> : vector<8x8xf32>
    %14 = tpu.matmul %11, %12, %cst_7 {dimension_numbers = #tpu.dot_dimension_numbers<[1], [1], [0], [0], [0, 0, 1, 0], [], []>} : vector<8x8xf32>, vector<8x8xf32>, vector<8x8xf32> -> vector<8x8xf32>
    %cst_8 = arith.constant dense<0xFF800000> : vector<8xf32>
    %15 = vector.multi_reduction <maximumf>, %14, %cst_8 [1] : vector<8x8xf32> to vector<8xf32>
    %16 = vector.shape_cast %15 : vector<8xf32> to vector<8x1xf32>
    %17 = vector.broadcast %16 : vector<8x1xf32> to vector<8x8xf32>
    %18 = arith.subf %14, %17 : vector<8x8xf32>
    %19 = math.exp %18 : vector<8x8xf32>
    %cst_9 = arith.constant dense<0.000000e+00> : vector<8xf32>
    %20 = vector.multi_reduction <add>, %19, %cst_9 [1] : vector<8x8xf32> to vector<8xf32>
    %21 = vector.shape_cast %20 : vector<8xf32> to vector<8x1xf32>
    %22 = tpu.reciprocal %21 {approx = true} : vector<8x1xf32> -> vector<8x1xf32>
    %23 = vector.broadcast %22 : vector<8x1xf32> to vector<8x8xf32>
    %24 = arith.mulf %19, %23 : vector<8x8xf32>
    %cst_10 = arith.constant dense<0.000000e+00> : vector<8x8xf32>
    %25 = tpu.matmul %24, %13, %cst_10 {dimension_numbers = #tpu.dot_dimension_numbers<[1], [0], [0], [1], [0, 0, 1, 1], [], []>} : vector<8x8xf32>, vector<8x8xf32>, vector<8x8xf32> -> vector<8x8xf32>
    %c0_11 = arith.constant 0 : index
    %c0_12 = arith.constant 0 : index
    %26 = vector.load %arg4[%c0_11, %c0_12] : memref<32x32xf32, #tpu.memory_space<vmem>>, vector<8x32xf32>
    %cst_13 = arith.constant dense<0.000000e+00> : vector<8x32xf32>
    %27 = tpu.matmul %25, %26, %cst_13 {dimension_numbers = #tpu.dot_dimension_numbers<[1], [0], [0], [1], [0, 0, 1, 1], [], []>} : vector<8x8xf32>, vector<8x32xf32>, vector<8x32xf32> -> vector<8x32xf32>
    %28 = arith.addf %10, %27 : vector<8x32xf32>
    %29 = vector.extract_strided_slice %7 {offsets = [0, 8], sizes = [8, 8], strides = [1, 1]} : vector<8x32xf32> to vector<8x8xf32>
    %30 = vector.extract_strided_slice %8 {offsets = [0, 8], sizes = [8, 8], strides = [1, 1]} : vector<8x32xf32> to vector<8x8xf32>
    %31 = vector.extract_strided_slice %9 {offsets = [0, 8], sizes = [8, 8], strides = [1, 1]} : vector<8x32xf32> to vector<8x8xf32>
    %cst_14 = arith.constant dense<0.000000e+00> : vector<8x8xf32>
    %32 = tpu.matmul %29, %30, %cst_14 {dimension_numbers = #tpu.dot_dimension_numbers<[1], [1], [0], [0], [0, 0, 1, 0], [], []>} : vector<8x8xf32>, vector<8x8xf32>, vector<8x8xf32> -> vector<8x8xf32>
    %cst_15 = arith.constant dense<0xFF800000> : vector<8xf32>
    %33 = vector.multi_reduction <maximumf>, %32, %cst_15 [1] : vector<8x8xf32> to vector<8xf32>
    %34 = vector.shape_cast %33 : vector<8xf32> to vector<8x1xf32>
    %35 = vector.broadcast %34 : vector<8x1xf32> to vector<8x8xf32>
    %36 = arith.subf %32, %35 : vector<8x8xf32>
    %37 = math.exp %36 : vector<8x8xf32>
    %cst_16 = arith.constant dense<0.000000e+00> : vector<8xf32>
    %38 = vector.multi_reduction <add>, %37, %cst_16 [1] : vector<8x8xf32> to vector<8xf32>
    %39 = vector.shape_cast %38 : vector<8xf32> to vector<8x1xf32>
    %40 = tpu.reciprocal %39 {approx = true} : vector<8x1xf32> -> vector<8x1xf32>
    %41 = vector.broadcast %40 : vector<8x1xf32> to vector<8x8xf32>
    %42 = arith.mulf %37, %41 : vector<8x8xf32>
    %cst_17 = arith.constant dense<0.000000e+00> : vector<8x8xf32>
    %43 = tpu.matmul %42, %31, %cst_17 {dimension_numbers = #tpu.dot_dimension_numbers<[1], [0], [0], [1], [0, 0, 1, 1], [], []>} : vector<8x8xf32>, vector<8x8xf32>, vector<8x8xf32> -> vector<8x8xf32>
    %c8 = arith.constant 8 : index
    %c0_18 = arith.constant 0 : index
    %44 = vector.load %arg4[%c8, %c0_18] : memref<32x32xf32, #tpu.memory_space<vmem>>, vector<8x32xf32>
    %cst_19 = arith.constant dense<0.000000e+00> : vector<8x32xf32>
    %45 = tpu.matmul %43, %44, %cst_19 {dimension_numbers = #tpu.dot_dimension_numbers<[1], [0], [0], [1], [0, 0, 1, 1], [], []>} : vector<8x8xf32>, vector<8x32xf32>, vector<8x32xf32> -> vector<8x32xf32>
    %46 = arith.addf %28, %45 : vector<8x32xf32>
    %47 = vector.extract_strided_slice %7 {offsets = [0, 16], sizes = [8, 8], strides = [1, 1]} : vector<8x32xf32> to vector<8x8xf32>
    %48 = vector.extract_strided_slice %8 {offsets = [0, 16], sizes = [8, 8], strides = [1, 1]} : vector<8x32xf32> to vector<8x8xf32>
    %49 = vector.extract_strided_slice %9 {offsets = [0, 16], sizes = [8, 8], strides = [1, 1]} : vector<8x32xf32> to vector<8x8xf32>
    %cst_20 = arith.constant dense<0.000000e+00> : vector<8x8xf32>
    %50 = tpu.matmul %47, %48, %cst_20 {dimension_numbers = #tpu.dot_dimension_numbers<[1], [1], [0], [0], [0, 0, 1, 0], [], []>} : vector<8x8xf32>, vector<8x8xf32>, vector<8x8xf32> -> vector<8x8xf32>
    %cst_21 = arith.constant dense<0xFF800000> : vector<8xf32>
    %51 = vector.multi_reduction <maximumf>, %50, %cst_21 [1] : vector<8x8xf32> to vector<8xf32>
    %52 = vector.shape_cast %51 : vector<8xf32> to vector<8x1xf32>
    %53 = vector.broadcast %52 : vector<8x1xf32> to vector<8x8xf32>
    %54 = arith.subf %50, %53 : vector<8x8xf32>
    %55 = math.exp %54 : vector<8x8xf32>
    %cst_22 = arith.constant dense<0.000000e+00> : vector<8xf32>
    %56 = vector.multi_reduction <add>, %55, %cst_22 [1] : vector<8x8xf32> to vector<8xf32>
    %57 = vector.shape_cast %56 : vector<8xf32> to vector<8x1xf32>
    %58 = tpu.reciprocal %57 {approx = true} : vector<8x1xf32> -> vector<8x1xf32>
    %59 = vector.broadcast %58 : vector<8x1xf32> to vector<8x8xf32>
    %60 = arith.mulf %55, %59 : vector<8x8xf32>
    %cst_23 = arith.constant dense<0.000000e+00> : vector<8x8xf32>
    %61 = tpu.matmul %60, %49, %cst_23 {dimension_numbers = #tpu.dot_dimension_numbers<[1], [0], [0], [1], [0, 0, 1, 1], [], []>} : vector<8x8xf32>, vector<8x8xf32>, vector<8x8xf32> -> vector<8x8xf32>
    %c16 = arith.constant 16 : index
    %c0_24 = arith.constant 0 : index
    %62 = vector.load %arg4[%c16, %c0_24] : memref<32x32xf32, #tpu.memory_space<vmem>>, vector<8x32xf32>
    %cst_25 = arith.constant dense<0.000000e+00> : vector<8x32xf32>
    %63 = tpu.matmul %61, %62, %cst_25 {dimension_numbers = #tpu.dot_dimension_numbers<[1], [0], [0], [1], [0, 0, 1, 1], [], []>} : vector<8x8xf32>, vector<8x32xf32>, vector<8x32xf32> -> vector<8x32xf32>
    %64 = arith.addf %46, %63 : vector<8x32xf32>
    %65 = vector.extract_strided_slice %7 {offsets = [0, 24], sizes = [8, 8], strides = [1, 1]} : vector<8x32xf32> to vector<8x8xf32>
    %66 = vector.extract_strided_slice %8 {offsets = [0, 24], sizes = [8, 8], strides = [1, 1]} : vector<8x32xf32> to vector<8x8xf32>
    %67 = vector.extract_strided_slice %9 {offsets = [0, 24], sizes = [8, 8], strides = [1, 1]} : vector<8x32xf32> to vector<8x8xf32>
    %cst_26 = arith.constant dense<0.000000e+00> : vector<8x8xf32>
    %68 = tpu.matmul %65, %66, %cst_26 {dimension_numbers = #tpu.dot_dimension_numbers<[1], [1], [0], [0], [0, 0, 1, 0], [], []>} : vector<8x8xf32>, vector<8x8xf32>, vector<8x8xf32> -> vector<8x8xf32>
    %cst_27 = arith.constant dense<0xFF800000> : vector<8xf32>
    %69 = vector.multi_reduction <maximumf>, %68, %cst_27 [1] : vector<8x8xf32> to vector<8xf32>
    %70 = vector.shape_cast %69 : vector<8xf32> to vector<8x1xf32>
    %71 = vector.broadcast %70 : vector<8x1xf32> to vector<8x8xf32>
    %72 = arith.subf %68, %71 : vector<8x8xf32>
    %73 = math.exp %72 : vector<8x8xf32>
    %cst_28 = arith.constant dense<0.000000e+00> : vector<8xf32>
    %74 = vector.multi_reduction <add>, %73, %cst_28 [1] : vector<8x8xf32> to vector<8xf32>
    %75 = vector.shape_cast %74 : vector<8xf32> to vector<8x1xf32>
    %76 = tpu.reciprocal %75 {approx = true} : vector<8x1xf32> -> vector<8x1xf32>
    %77 = vector.broadcast %76 : vector<8x1xf32> to vector<8x8xf32>
    %78 = arith.mulf %73, %77 : vector<8x8xf32>
    %cst_29 = arith.constant dense<0.000000e+00> : vector<8x8xf32>
    %79 = tpu.matmul %78, %67, %cst_29 {dimension_numbers = #tpu.dot_dimension_numbers<[1], [0], [0], [1], [0, 0, 1, 1], [], []>} : vector<8x8xf32>, vector<8x8xf32>, vector<8x8xf32> -> vector<8x8xf32>
    %c24 = arith.constant 24 : index
    %c0_30 = arith.constant 0 : index
    %80 = vector.load %arg4[%c24, %c0_30] : memref<32x32xf32, #tpu.memory_space<vmem>>, vector<8x32xf32>
    %cst_31 = arith.constant dense<0.000000e+00> : vector<8x32xf32>
    %81 = tpu.matmul %79, %80, %cst_31 {dimension_numbers = #tpu.dot_dimension_numbers<[1], [0], [0], [1], [0, 0, 1, 1], [], []>} : vector<8x8xf32>, vector<8x32xf32>, vector<8x32xf32> -> vector<8x32xf32>
    %82 = arith.addf %64, %81 : vector<8x32xf32>
    %c0_32 = arith.constant 0 : index
    %c0_33 = arith.constant 0 : index
    %83 = vector.load %arg5[%c0_32, %c0_33] : memref<1x32xf32, #tpu.memory_space<vmem>>, vector<1x32xf32>
    %84 = vector.broadcast %83 : vector<1x32xf32> to vector<8x32xf32>
    %85 = arith.addf %82, %84 : vector<8x32xf32>
    %c0_34 = arith.constant 0 : index
    %c0_35 = arith.constant 0 : index
    %c0_36 = arith.constant 0 : index
    %86 = vector.load %arg6[%c0_34, %c0_35, %c0_36] : memref<1x8x32xf32, #tpu.memory_space<vmem>>, vector<1x8x32xf32>
    %87 = vector.shape_cast %86 : vector<1x8x32xf32> to vector<8x32xf32>
    %88 = vector.shape_cast %85 : vector<8x32xf32> to vector<1x8x32xf32>
    tpu.vector_store %arg6[%c0_34, %c0_35, %c0_36], %88 {strides = array<i32>} : memref<1x8x32xf32, #tpu.memory_space<vmem>>, vector<1x8x32xf32>,
    return
  }
  func.func @transform_0(%arg0: i32) -> (i32, i32, i32) {
    %c0_i32 = arith.constant 0 : i32
    %c0_i32_0 = arith.constant 0 : i32
    %c0_i32_1 = arith.constant 0 : i32
    return %arg0, %c0_i32, %c0_i32_0 : i32, i32, i32
  }
  func.func @transform_1(%arg0: i32) -> (i32, i32) {
    %c0_i32 = arith.constant 0 : i32
    %c0_i32_0 = arith.constant 0 : i32
    %c0_i32_1 = arith.constant 0 : i32
    return %c0_i32, %c0_i32_0 : i32, i32
  }
  func.func @transform_2(%arg0: i32) -> (i32, i32) {
    %c0_i32 = arith.constant 0 : i32
    %c0_i32_0 = arith.constant 0 : i32
    %c0_i32_1 = arith.constant 0 : i32
    return %c0_i32, %c0_i32_0 : i32, i32
  }
  func.func @transform_3(%arg0: i32) -> (i32, i32) {
    %c0_i32 = arith.constant 0 : i32
    %c0_i32_0 = arith.constant 0 : i32
    %c0_i32_1 = arith.constant 0 : i32
    return %c0_i32, %c0_i32_0 : i32, i32
  }
  func.func @transform_4(%arg0: i32) -> (i32, i32) {
    %c0_i32 = arith.constant 0 : i32
    %c0_i32_0 = arith.constant 0 : i32
    %c0_i32_1 = arith.constant 0 : i32
    return %c0_i32, %c0_i32_0 : i32, i32
  }
  func.func @transform_5(%arg0: i32) -> (i32, i32, i32) {
    %c0_i32 = arith.constant 0 : i32
    %c0_i32_0 = arith.constant 0 : i32
    %c0_i32_1 = arith.constant 0 : i32
    return %arg0, %c0_i32, %c0_i32_0 : i32, i32, i32
  }
}

</mosaic_0001>

<bundles_post_ra>
// kernel: tpu_custom_call.1
= control target key start
LH: loop header
LB: loop body
LE: loop exit
PB: predicated region body
PF: predicated region fallthrough
CT: control target
= control target key end

     0   :  { %10 = vsyncpa [#allocation3], 0  ;;  %s2190_s0 = inlined_call_operand.hbm [shape: f32[2,8,32], index: 0, kind: input, shape index: {}]   ;;  %s2191_s1 = inlined_call_operand.hbm [shape: f32[32,96], index: 1, kind: input, shape index: {}]   ;;  %s2192_s2 = inlined_call_operand.vmem [shape: f32[1,96], index: 2, kind: input, shape index: {}]   ;;  %s2193_s3 = inlined_call_operand.hbm [shape: f32[32,32], index: 3, kind: input, shape index: {}]   ;;  %s2194_s4 = inlined_call_operand.vmem [shape: f32[1,32], index: 4, kind: input, shape index: {}]   ;;  %s2195_s5 = inlined_call_operand.hbm [shape: f32[2,8,32], index: 5, kind: output, shape index: {}]  }
   0x1   :  { %12 = vsyncpa [#allocation3 + $0x1], 0 }
   0x2   :  { %13 = vsyncpa [#allocation6], 0 }
   0x3   :  { %14 = vsyncpa [#allocation4], 0 }
   0x4   :  { %16 = vsyncpa [#allocation4 + $0x1], 0  ;;  %s1873_s18 = smov 0   ;;  %s1875_s19 = smov 0  }
   0x5   :  { %s1877_s20 = smov 0   ;;  %s1879_s21 = smov 0  }
   0x6 LB: > { %s1894_s22 = sadd.s32 4294967295, %s1821_s21   ;;  %s1425_s23 = sadd.s32 4294967294, %s1821_s21   ;;  %s1821_s21 = sphi %s1879_s21, %s2215_s21   ;;  %s1817_s20 = sphi %s1877_s20, %s2214_s20   ;;  %s1813_s19 = sphi %s1875_s19, %s2213_s19   ;;  %s1809_s18 = sphi %s1873_s18, %s2212_s18  }
   0x7   : > { %p42_p0 = scmp.ne.s32.totalorder %s1813_s19, %s1809_s18  ;;  %p2196_p1 = scmp.eq.s32.totalorder %s1894_s22, 0 }
   0x8   : > { %p156_p3 = scmp.eq.s32.totalorder %s1425_s23, 1  ;;  %p1426_p5 = scmp.ge.s32.totalorder %s1821_s21, 1 }
   0x9   : > { %p1903_p4 = por %p2196_p1, %p42_p0  ;;  %p163_p7 = scmp.lt.s32.totalorder %s1821_s21, 3 }
   0xa   : > { %p1908_p6 = por %p156_p3, %p42_p0  ;;  %s1823_s27 = smov [#allocation5]  }
   0xb   : > { %s2199_s24 = scalar_select %p1903_p4, 1, 0 }
   0xc   : > { %s2200_s25 = scalar_select %p1908_p6, 1, 0 }
   0xd   : > { %p1913_p8 = pnand %p1426_p5, %p163_p7  ;;  %s175_s28 = sshll.u32 %s1823_s27, 4  ;;  %s1917_s28 = int_to_ptr.vmem [resolvable:$true] %s175_s28 }
   0xe   : > { %s1824_s30 = smov [#allocation7]   ;;  %s1665_s9 = scalar_lea.hbm %s2191_s1, 512 }
   0xf   : > { %p1578_p9 = pneg %p1913_p8  ;;  %s191_s6 = sshll.u32 %s1824_s30, 4  ;;  %s1928_s6 = int_to_ptr.vmem [resolvable:$true] %s191_s6 }
  0x10   : > { %p1666_p12 = scmp.ne.s32.totalorder %s2191_s1, %s1665_s9  ;;  %p1672_p5 = scmp.lt.u32.totalorder %s1665_s9, %s2191_s1 }
  0x11   : > { %p1924_p11 = pnand %p1578_p9, %p2196_p1 }
  0x13   : > { %p1667_p13 = pneg %p1924_p11 }
  0x15   : > { %p1668_p0 = pnand %p1667_p13, %p1666_p12 }
  0x17   : > { %p1669_p3 = pneg %p1668_p0 }
  0x19   : > { %p1674_p7 = pnand %p1672_p5, %p1669_p3 }
  0x1b   : > { %1677 = shalt.err (!%p1674_p7)
}
  0x1c   : > { %s1678_s14 = scalar_lea.vmem %s1917_s28, 512  ;;  %p1686_p2 = scmp.lt.s32.totalorder %s1917_s28, %s1917_s28 }
  0x1d   : > { %p1679_p9 = scmp.ne.s32.totalorder %s1917_s28, %s1678_s14  ;;  %p1687_p12 = scmp.lt.s32.totalorder %s1678_s14, %s1678_s14 }
  0x1f   : > { %p1681_p10 = pnand %p1679_p9, %p1667_p13  ;;  %p1688_p0 = por %p1687_p12, %p1686_p2 }
  0x21   : > { %p1682_p1 = pneg %p1681_p10 }
  0x23   : > { %p1689_p6 = pnand %p1688_p0, %p1682_p1 }
  0x25   : > { %1692 = shalt.err (!%p1689_p6)
}
  0x26   : > { %s1825_s15 = smov 128   ;;  %s1826_s16 = smov 8  }
  0x27   : > { %1581 = dma.hbm_to_vmem [thread:$0]  (!%p1924_p11), %s2191_s1, 512, %s1917_s28, [#allocation6], %s1825_s15, %s1825_s15, %s1826_s16  }
  0x28   : > { %s1693_s7 = scalar_lea.hbm %s2193_s3, 512 }
  0x29   : > { %p1694_p2 = scmp.ne.s32.totalorder %s2193_s3, %s1693_s7  ;;  %p1700_p10 = scmp.lt.u32.totalorder %s1693_s7, %s2193_s3 }
  0x2b   : > { %p1696_p1 = pnand %p1694_p2, %p1667_p13 }
  0x2d   : > { %p1697_p6 = pneg %p1696_p1 }
  0x2f   : > { %p1702_p3 = pnand %p1700_p10, %p1697_p6 }
  0x31   : > { %1705 = shalt.err (!%p1702_p3)
}
  0x32   : > { %s1706_s28 = scalar_lea.vmem %s1928_s6, 512  ;;  %p1714_p12 = scmp.lt.s32.totalorder %s1928_s6, %s1928_s6 }
  0x33   : > { %p1707_p5 = scmp.ne.s32.totalorder %s1928_s6, %s1706_s28  ;;  %p1715_p0 = scmp.lt.s32.totalorder %s1706_s28, %s1706_s28 }
  0x35   : > { %p1709_p7 = pnand %p1707_p5, %p1667_p13  ;;  %p1716_p2 = por %p1715_p0, %p1714_p12 }
  0x37   : > { %p1710_p9 = pneg %p1709_p7 }
  0x39   : > { %p1717_p1 = pnand %p1716_p2, %p1710_p9 }
  0x3b   : > { %1720 = shalt.err (!%p1717_p1)
}
  0x3c   : > { %1584 = dma.hbm_to_vmem [thread:$0]  (!%p1924_p11), %s2193_s3, 512, %s1928_s6, [#allocation6], %s1825_s15, %s1825_s15, %s1826_s16  }
  0x3d   : > { %s1983_s14 = sadd.s32 1, %s1821_s21   ;;  %s29_s29 = sadd.s32 1, %s1817_s20 }
  0x3e   : > { %s26_s17 = ssub.s32 %s1821_s21, %s1983_s14  ;;  %p36_p13 = scmp.ne.s32.totalorder %s1817_s20, %s1813_s19 }
  0x3f   : > { %p27_p6 = scmp.eq.s32.totalorder %s26_s17, 0  ;;  %p37_p10 = scmp.eq.s32.totalorder %s1821_s21, 0 }
  0x40   : > { %p2203_p3 = scmp.eq.s32.totalorder %s1894_s22, 1  ;;  %p1595_p7 = scmp.lt.s32.totalorder %s1821_s21, 2 }
  0x41   : > { %s1999_s27 = scalar_select %p27_p6, %s1817_s20, %s29_s29  }
  0x42   : > { %p1993_p5 = por %p2203_p3, %p36_p13  ;;  %p38_p9 = por %p37_p10, %p36_p13 }
  0x43   : > { %s208_s30 = sand.u32 1, %s1817_s20   ;;  %s1431_s6 = sshll.u32 %s1821_s21, 7 }
  0x44   : > { %s2204_s23 = scalar_select %p1993_p5, 1, 0 }
  0x45   : > { %s1430_s7 = sshll.u32 %s208_s30, 3  ;;  %s2006_s8 = scalar_lea.hbm %s2190_s0, %s1431_s6 }
  0x46   : > { %s212_s9 = scalar_lea.vmem [#allocation2], %s1430_s7  ;;  %p2010_p11 = pnand %p1595_p7, %p38_p9 }
  0x47   : > { %s219_s10 = sshll.u32 %s212_s9, 4  ;;  %s209_s28 = scalar_lea.sflag [#allocation3], %s208_s30  ;;  %s2008_s10 = int_to_ptr.vmem [resolvable:$true] %s219_s10 }
  0x48   : > { %s1721_s12 = scalar_lea.hbm %s2006_s8, 128  ;;  %p1723_p0 = pneg %p2010_p11 }
  0x49   : > { %p1722_p12 = scmp.ne.s32.totalorder %s2006_s8, %s1721_s12  ;;  %s1726_s17 = scalar_lea.hbm %s2190_s0, 256 }
  0x4a   : > { %p1727_p13 = scmp.lt.u32.totalorder %s2006_s8, %s2190_s0  ;;  %p1728_p6 = scmp.lt.u32.totalorder %s1726_s17, %s1721_s12 }
  0x4b   : > { %p1724_p2 = pnand %p1723_p0, %p1722_p12  ;;  %p1730_p3 = scmp.lt.u32.totalorder %s1721_s12, %s2006_s8 }
  0x4c   : > { %p1729_p10 = por %p1728_p6, %p1727_p13 }
  0x4d   : > { %p1725_p1 = pneg %p1724_p2 }
  0x4e   : > { %p1731_p7 = por %p1730_p3, %p1729_p10 }
  0x50   : > { %p1732_p9 = pnand %p1731_p7, %p1725_p1 }
  0x52   : > { %1735 = shalt.err (!%p1732_p9)
}
  0x53   : > { %s1736_s30 = scalar_lea.vmem %s2008_s10, 128  ;;  %s1827_s15 = smov [#allocation2]  }
  0x54   : > { %p1737_p12 = scmp.ne.s32.totalorder %s2008_s10, %s1736_s30  ;;  %s1741_s16 = sshll.u32 %s1827_s15, 4  ;;  %s1742_s16 = int_to_ptr.vmem [resolvable:$false] %s1741_s16 }
  0x55   : > { %s1743_s9 = scalar_lea.vmem %s1742_s16, 256  ;;  %p1744_p4 = scmp.lt.s32.totalorder %s2008_s10, %s1742_s16 }
  0x56   : > { %p1739_p2 = pnand %p1737_p12, %p1723_p0  ;;  %p1745_p13 = scmp.lt.s32.totalorder %s1743_s9, %s1736_s30 }
  0x58   : > { %p1740_p5 = pneg %p1739_p2  ;;  %p1746_p6 = por %p1745_p13, %p1744_p4 }
  0x5a   : > { %p1747_p10 = pnand %p1746_p6, %p1740_p5 }
  0x5c   : > { %1750 = shalt.err (!%p1747_p10)
}
  0x5d   : > { %1588 = dma.hbm_to_vmem [thread:$0]  (!%p2010_p11), %s2006_s8, 128, %s2008_s10, %s209_s28  }
  0x5e   : > { %228 = sbr.rel (%p1913_p8) target bundleno = 2691 (0xa83), region = 40  ;;  %s2042_s12 = sand.u32 (!%p1913_p8), 1, %s1813_s19  }
  0x5f   : > { %s1433_s13 = sshll.u32 (!%p1913_p8), %s2042_s12, 3  ;;  %s231_s29 = scalar_lea.sflag (!%p1913_p8), [#allocation3], %s2042_s12 }
  0x60   : > { %s234_s17 = scalar_lea.vmem (!%p1913_p8), [#allocation2], %s1433_s13  ;;  %p2206_p4 = scmp.ne.s32.totalorder (!%p1913_p8), %s2199_s24, 0 }
  0x65   : > { %1796 = dma.done.wait (%p2206_p4), %s231_s29, 128  }
  0x66   : > { %1798 = vsyncadd (%p2206_p4), %s231_s29, 4294967168  ;;  %p2207_p5 = scmp.eq.s32.totalorder %s1894_s22, 0 }
  0x68   : > { %1800 = dma.done.wait (%p2207_p5), [#allocation6], 1024   ;;  %p2208_p8 = pmov %p2207_p5 }
  0x69   : > { %v1828_v0 = vmov 0.0|0.0   ;;  %vm1829_vm0 = vmmov 0   ;;  %v1830_v1 = vmov 0.0   ;;  %v270_v2 = vld [vmem:[#allocation5] sm:$0xff]  ;;  %v271_v3 = vld [vmem:[#allocation5 + $0x8] sm:$0xff]  ;;  %v272_v4 = vld [vmem:[#allocation5 + $0x10] sm:$0xff] }
  0x6a   : > { %1802 = vsyncadd (%p2208_p8), [#allocation6], 4294966272  ;;  %1560 = vmatprep.subr.bf16.mxu0 %v1828_v0  ;;  %1497 = vmatprep.mubr.msk.f32.mxu0 %vm1829_vm0, %v1830_v1  ;;  %v1561_v5 = vpack.c.bf16 %v271_v3, %v270_v2  ;;  %v273_v6 = vld [vmem:[#allocation5 + $0x18] sm:$0xff]  ;;  %vm281_vm1 = vcmask 261120   ;;  %v1437_v9 = vld [vmem:[%s2192_s2] ss:$0 sm:$0xff] }
  0x6b   : > { %1500 = vmatprep.subr.mxu1 %v1830_v1  ;;  %1502 = vmatprep.mubr.msk.f32.mxu1 %vm1829_vm0, %v1830_v1  ;;  %v1564_v7 = vpack.c.bf16 %v273_v6, %v272_v4  ;;  %v269_v8 = vld [vmem:[%s234_s17] sm:$0xff]  ;;  %s1831_s8 = smov 120   ;;  %s1832_s10 = smov 96   ;;  %vm358_vm2 = vcmask 64512   ;;  %v686_v32 = vld [vmem:[#allocation7 + $0x8] sm:$0xff]  ;;  %v520_v41 = vld [vmem:[#allocation7] sm:$0xff] }
  0x6c   : > { %1562 = vmatpush3.bf16.msra.mxu0 %v1561_v5  ;;  %s1833_s11 = smov 88   ;;  %s1834_s28 = smov 56   ;;  %v998_v4 = vld [vmem:[#allocation7 + $0x10] sm:$0xff] }
  0x6d   : > { %1563 = vmatprep.subr.bf16.mxu0 %v1828_v0  ;;  %s1835_s7 = smov 64   ;;  %s1836_s6 = smov 80  }
  0x6e   : > { %s1837_s30 = smov 112   ;;  %s1838_s15 = smov 72  }
  0x6f   : > { %s1839_s16 = smov 104   ;;  %s1840_s9 = smov 48  }
  0x70   : > { %1565 = vmatpush3.bf16.msra.mxu0 %v1564_v7  ;;  %s1841_s29 = smov 40   ;;  %s1457_s26 = sshll.u32 %s1894_s22, 7 }
  0x71   : > { %1510 = vmatprep.subr.mxu0 %v1830_v1  ;;  %p2209_p0 = scmp.ne.s32.totalorder %s2204_s23, 0 }
  0x73   : > { %1498 = vmatmul.mubr.msk.f32.vlgmr.msra.gmra.mrb[0].mxu0 %vm281_vm1, %v269_v8 }
  0x74   : > { %1512 = vmatprep.mubr.msk.f32.mxu0 %vm1829_vm0, %v1830_v1 }
 0x146   : > { %v351_v10 = vpop.f32.mrb[0].mxu0 }
 0x147   : > { %v2068_v11 = vadd.f32 %v1437_v9, %v351_v10  ;;  %v1499_v12 = vpop.f32.mrb[1].mxu0 }
 0x149   : > { %521 = vrot.lane.b32.xlu1 %v2068_v11, %s1831_s8  ;;  %356 = vrot.lane.b32.xlu0 %v2068_v11, %s1832_s10  ;;  %s268_s8 = scalar_lea.vmem [#allocation8], %s1433_s13  ;;  %s1842_s13 = smov [#allocation8]  }
 0x14a   : > { %s1336_s10 = sshll.u32 %s268_s8, 4  ;;  %s2147_s10 = int_to_ptr.vmem [resolvable:$true] %s1336_s10 }
 0x14b   : > { %s1751_s22 = scalar_lea.vmem %s2147_s10, 128 }
 0x14c   : > { %p1752_p11 = scmp.ne.s32.totalorder %s2147_s10, %s1751_s22 }
 0x14d   : > { %523 = vrot.lane.b32.xlu0 %v2068_v11, %s1833_s11 }
 0x14e   : > { %p1753_p1 = pnand %p1752_p11, %p2209_p0 }
 0x150   : > { %p1754_p3 = pneg %p1753_p1 }
 0x1bb   : > { %v357_v13 = vpop.permute.xlu0 %356  ;;  %v522_v15 = vpop.permute.xlu1 %521 }
 0x1bc   : > { %1501 = vmatpush3.xpose.msk.msra.mxu1 %vm358_vm2, %v357_v13 }
 0x1bd   : > { %1505 = vmatprep.subr.mxu1 %v1830_v1 }
 0x1bf   : > { %1503 = vmatmul.mubr.msk.f32.vlgmr.msra.gmra.mrb[0].mxu1 %vm358_vm2, %v2068_v11  ;;  %v524_v14 = vpop.permute.xlu0 %523 }
 0x1c0   : > { %1511 = vmatpush3.xpose.msk.msra.mxu0 %vm358_vm2, %v524_v14  ;;  %1507 = vmatprep.mubr.msk.f32.mxu1 %vm1829_vm0, %v1830_v1 }
 0x1c1   : > { %1520 = vmatprep.subr.mxu0 %v1830_v1 }
 0x1c3   : > { %1513 = vmatmul.mubr.msk.f32.vlgmr.msra.gmra.mrb[2].mxu0 %vm358_vm2, %v522_v15 }
 0x1c4   : > { %1522 = vmatprep.mubr.msk.f32.mxu0 %vm1829_vm0, %v1830_v1  ;;  %1521 = vmatpush3.msra.mxu0 %v686_v32 }
 0x1c5   : > { %1530 = vmatprep.subr.mxu0 %v1830_v1 }
 0x292   : > { %v429_v16 = vpop.f32.mrb[0].mxu1 }
 0x293   : > { %v1504_v17 = vpop.f32.mrb[1].mxu1  ;;  %v433_v18 = vsel %vm358_vm2, %v429_v16, -inf }
 0x294   : > { %434 = vmax.xlane.f32.xlu1 %v433_v18 }
 0x296   : > { %v595_v19 = vpop.f32.mrb[2].mxu0 }
 0x297   : > { %v1514_v20 = vpop.f32.mrb[3].mxu0  ;;  %v599_v21 = vsel %vm358_vm2, %v595_v19, -inf }
 0x298   : > { %600 = vmax.xlane.f32.xlu0 %v599_v21 }
 0x321   : > { %v435_v22 = vpop.xlane.xlu1 %434 }
 0x322   : > { %v436_v23 = vsub.f32 %v429_v16, %v435_v22 }
 0x324   : > { %v437_v24 = vmul.f32 1.442695, %v436_v23 }
 0x325   : > { %v601_v25 = vpop.xlane.xlu0 %600 }
 0x326   : > { %1649 = vpow2.f32 %v437_v24  ;;  %v602_v26 = vsub.f32 %v595_v19, %v601_v25  ;;  %v1455_v25 = vld [vmem:[%s2194_s4] ss:$0 sm:$0xff] }
 0x328   : > { %v603_v27 = vmul.f32 1.442695, %v602_v26 }
 0x32a   : > { %1651 = vpow2.f32 %v603_v27 }
 0x330   : > { %v1650_v28 = vpop.eup %1649 }
 0x331   : > { %v439_v29 = vsel %vm358_vm2, %v1650_v28, 0.0 }
 0x332   : > { %440 = vadd.xlane.f32.xlu0 %v439_v29 }
 0x334   : > { %v1652_v30 = vpop.eup %1651 }
 0x335   : > { %v605_v31 = vsel %vm358_vm2, %v1652_v30, 0.0 }
 0x336   : > { %606 = vadd.xlane.f32.xlu1 %v605_v31 }
 0x347   : > { %610 = vrot.lane.b32.xlu1 %v2068_v11, %s1834_s28 }
 0x348   : > { %444 = vrot.lane.b32.xlu0 %v2068_v11, %s1835_s7  ;;  %s2145_s7 = scalar_lea.hbm %s2195_s5, %s1457_s26 }
 0x34b   : > { %835 = vrot.lane.b32.xlu1 %v2068_v11, %s1836_s6  ;;  %s1323_s6 = scalar_lea.sflag [#allocation4], %s2042_s12 }
 0x34c   : > { %833 = vrot.lane.b32.xlu0 %v2068_v11, %s1837_s30  ;;  %s1755_s30 = sshll.u32 %s1842_s13, 4  ;;  %s1756_s30 = int_to_ptr.vmem [resolvable:$false] %s1755_s30 }
 0x34d   : > { %p1758_p7 = scmp.lt.s32.totalorder %s2147_s10, %s1756_s30 }
 0x3bf   : > { %v441_v33 = vpop.xlane.xlu0 %440 }
 0x3c0   : > { %1653 = vrcp.f32 %v441_v33 }
 0x3c3   : > { %v607_v34 = vpop.xlane.xlu1 %606  ;;  %v445_v35 = vpop.permute.xlu0 %444 }
 0x3c4   : > { %1655 = vrcp.f32 %v607_v34  ;;  %1506 = vmatpush3.msra.mxu1 %v445_v35 }
 0x3c5   : > { %1515 = vmatprep.subr.mxu1 %v1830_v1 }
 0x3c7   : > { %v611_v38 = vpop.permute.xlu1 %610  ;;  %v834_v47 = vpop.permute.xlu0 %833 }
 0x3ca   : > { %v1654_v36 = vpop.eup %1653 }
 0x3cb   : > { %v443_v37 = vmul.f32 %v1654_v36, %v1650_v28  ;;  %v836_v45 = vpop.permute.xlu1 %835 }
 0x3cd   : > { %1508 = vmatmul.mubr.msk.f32.vlgmr.msra.gmra.mrb[2].mxu1 %vm358_vm2, %v443_v37 }
 0x3ce   : > { %v1656_v39 = vpop.eup %1655  ;;  %1516 = vmatpush3.msra.mxu1 %v611_v38  ;;  %1517 = vmatprep.mubr.msk.f32.mxu1 %vm1829_vm0, %v1830_v1 }
 0x3cf   : > { %v609_v40 = vmul.f32 %v1656_v39, %v1652_v30  ;;  %1525 = vmatprep.subr.mxu1 %v1830_v1 }
 0x3d1   : > { %1518 = vmatmul.mubr.msk.f32.vlgmr.msra.gmra.mrb[4].mxu1 %vm358_vm2, %v609_v40 }
 0x3d2   : > { %1527 = vmatprep.mubr.msk.f32.mxu1 %vm1829_vm0, %v1830_v1  ;;  %1526 = vmatpush3.msra.mxu1 %v520_v41 }
 0x3d3   : > { %1535 = vmatprep.subr.mxu1 %v1830_v1 }
 0x4a0   : > { %v516_v42 = vpop.f32.mrb[2].mxu1 }
 0x4a1   : > { %v1509_v43 = vpop.f32.mrb[3].mxu1  ;;  %1528 = vmatmul.mubr.msk.f32.vlgmr.msra.gmra.mrb[6].mxu1 %vm358_vm2, %v516_v42 }
 0x4a2   : > { %1537 = vmatprep.mubr.msk.f32.mxu1 %vm1829_vm0, %v1830_v1 }
 0x4a4   : > { %v682_v44 = vpop.f32.mrb[4].mxu1 }
 0x4a5   : > { %v1519_v46 = vpop.f32.mrb[5].mxu1  ;;  %1523 = vmatmul.mubr.msk.f32.vlgmr.msra.gmra.mrb[4].mxu0 %vm358_vm2, %v682_v44 }
 0x4a6   : > { %1531 = vmatpush3.xpose.msk.msra.mxu0 %vm358_vm2, %v836_v45  ;;  %1532 = vmatprep.mubr.msk.f32.mxu0 %vm1829_vm0, %v1830_v1 }
 0x4a7   : > { %1540 = vmatprep.subr.mxu0 %v1830_v1 }
 0x4a9   : > { %1533 = vmatmul.mubr.msk.f32.vlgmr.msra.gmra.mrb[6].mxu0 %vm358_vm2, %v834_v47 }
 0x4aa   : > { %1542 = vmatprep.mubr.msk.f32.mxu0 %vm1829_vm0, %v1830_v1  ;;  %1541 = vmatpush3.msra.mxu0 %v998_v4 }
 0x4ab   : > { %1550 = vmatprep.subr.mxu0 %v1830_v1 }
 0x574   : > { %v829_v48 = vpop.f32.mrb[6].mxu1 }
 0x575   : > { %v1529_v49 = vpop.f32.mrb[7].mxu1 }
 0x578   : > { %v756_v50 = vpop.f32.mrb[4].mxu0 }
 0x579   : > { %v830_v51 = vadd.f32 %v829_v48, %v756_v50  ;;  %v1524_v52 = vpop.f32.mrb[5].mxu0 }
 0x57c   : > { %v907_v53 = vpop.f32.mrb[6].mxu0 }
 0x57d   : > { %v1534_v54 = vpop.f32.mrb[7].mxu0  ;;  %v911_v55 = vsel %vm358_vm2, %v907_v53, -inf }
 0x57e   : > { %912 = vmax.xlane.f32.xlu1 %v911_v55 }
 0x58f   : > { %1075 = vrot.lane.b32.xlu1 %v2068_v11, %s1838_s15  ;;  %s1757_s15 = scalar_lea.vmem %s1756_s30, 256 }
 0x590   : > { %p1759_p9 = scmp.lt.s32.totalorder %s1757_s15, %s1751_s22 }
 0x592   : > { %p1760_p12 = por %p1759_p9, %p1758_p7 }
 0x593   : > { %1073 = vrot.lane.b32.xlu1 %v2068_v11, %s1839_s16 }
 0x594   : > { %p1761_p2 = pnand %p1760_p12, %p1754_p3 }
 0x60b   : > { %v913_v56 = vpop.xlane.xlu1 %912 }
 0x60c   : > { %v914_v57 = vsub.f32 %v907_v53, %v913_v56 }
 0x60e   : > { %v915_v58 = vmul.f32 1.442695, %v914_v57 }
 0x60f   : > { %v1076_v0 = vpop.permute.xlu1 %1075 }
 0x610   : > { %1657 = vpow2.f32 %v915_v58 }
 0x613   : > { %v1074_v3 = vpop.permute.xlu1 %1073 }
 0x61a   : > { %v1658_v59 = vpop.eup %1657 }
 0x61b   : > { %v917_v60 = vsel %vm358_vm2, %v1658_v59, 0.0 }
 0x61c   : > { %918 = vadd.xlane.f32.xlu0 %v917_v60 }
 0x632   : > { %922 = vrot.lane.b32.xlu0 %v2068_v11, %s1840_s9 }
 0x6a9   : > { %v919_v61 = vpop.xlane.xlu0 %918 }
 0x6aa   : > { %1659 = vrcp.f32 %v919_v61 }
 0x6ad   : > { %v923_v62 = vpop.permute.xlu0 %922 }
 0x6ae   : > { %1536 = vmatpush3.msra.mxu1 %v923_v62 }
 0x6af   : > { %1545 = vmatprep.subr.mxu1 %v1830_v1 }
 0x6b4   : > { %v1660_v63 = vpop.eup %1659 }
 0x6b5   : > { %v921_v2 = vmul.f32 %v1660_v63, %v1658_v59 }
 0x6b7   : > { %1538 = vmatmul.mubr.msk.f32.vlgmr.msra.gmra.mrb[8].mxu1 %vm358_vm2, %v921_v2 }
 0x6b8   : > { %1546 = vmatpush3.xpose.msk.msra.mxu1 %vm358_vm2, %v1076_v0  ;;  %1547 = vmatprep.mubr.msk.f32.mxu1 %vm1829_vm0, %v1830_v1 }
 0x6b9   : > { %1555 = vmatprep.subr.mxu1 %v1830_v1 }
 0x6bb   : > { %1548 = vmatmul.mubr.msk.f32.vlgmr.msra.gmra.mrb[10].mxu1 %vm358_vm2, %v1074_v3 }
 0x6bc   : > { %1557 = vmatprep.mubr.msk.f32.mxu1 %vm1829_vm0, %v1830_v1 }
 0x78a   : > { %v994_v5 = vpop.f32.mrb[8].mxu1 }
 0x78b   : > { %v1539_v6 = vpop.f32.mrb[9].mxu1  ;;  %1543 = vmatmul.mubr.msk.f32.vlgmr.msra.gmra.mrb[8].mxu0 %vm358_vm2, %v994_v5 }
 0x78c   : > { %1552 = vmatprep.mubr.msk.f32.mxu0 %vm1829_vm0, %v1830_v1  ;;  %v1238_v1 = vld [vmem:[#allocation7 + $0x18] sm:$0xff] }
 0x78d   : > { %1556 = vmatpush3.msra.mxu1 %v1238_v1 }
 0x78e   : > { %v1147_v7 = vpop.f32.mrb[10].mxu1 }
 0x78f   : > { %v1549_v8 = vpop.f32.mrb[11].mxu1  ;;  %v1151_v9 = vsel %vm358_vm2, %v1147_v7, -inf }
 0x790   : > { %1152 = vmax.xlane.f32.xlu0 %v1151_v9 }
 0x7a6   : > { %1162 = vrot.lane.b32.xlu0 %v2068_v11, %s1841_s29 }
 0x81d   : > { %v1153_v10 = vpop.xlane.xlu0 %1152 }
 0x81e   : > { %v1154_v12 = vsub.f32 %v1147_v7, %v1153_v10 }
 0x820   : > { %v1155_v13 = vmul.f32 1.442695, %v1154_v12 }
 0x821   : > { %v1163_v14 = vpop.permute.xlu0 %1162 }
 0x822   : > { %1661 = vpow2.f32 %v1155_v13  ;;  %1551 = vmatpush3.msra.mxu0 %v1163_v14 }
 0x82c   : > { %v1662_v15 = vpop.eup %1661 }
 0x82d   : > { %v1157_v16 = vsel %vm358_vm2, %v1662_v15, 0.0 }
 0x82e   : > { %1158 = vadd.xlane.f32.xlu1 %v1157_v16 }
 0x85e   : > { %v1068_v17 = vpop.f32.mrb[8].mxu0 }
 0x85f   : > { %v1072_v18 = vadd.f32 %v1068_v17, %v830_v51  ;;  %v1544_v19 = vpop.f32.mrb[9].mxu0 }
 0x8bb   : > { %v1159_v20 = vpop.xlane.xlu1 %1158 }
 0x8bc   : > { %1663 = vrcp.f32 %v1159_v20 }
 0x8c6   : > { %v1664_v11 = vpop.eup %1663 }
 0x8c7   : > { %v1161_v21 = vmul.f32 %v1664_v11, %v1662_v15 }
 0x8c9   : > { %1553 = vmatmul.mubr.msk.f32.vlgmr.msra.gmra.mrb[10].mxu0 %vm358_vm2, %v1161_v21 }
 0x99c   : > { %v1234_v22 = vpop.f32.mrb[10].mxu0 }
 0x99d   : > { %v1554_v23 = vpop.f32.mrb[11].mxu0  ;;  %1558 = vmatmul.mubr.msk.f32.vlgmr.msra.gmra.mrb[12].mxu1 %vm358_vm2, %v1234_v22 }
 0xa70   : > { %v1308_v24 = vpop.f32.mrb[12].mxu1 }
 0xa71   : > { %v1312_v26 = vadd.f32 %v1308_v24, %v1072_v18  ;;  %v1559_v27 = vpop.f32.mrb[13].mxu1 }
 0xa73   : > { %v1320_v28 = vadd.f32 %v1455_v25, %v1312_v26 }
 0xa75   : > { %1321 = vst.msk [vmem:[%s268_s8] sm:$0xff] %vm281_vm1, %v1320_v28 }
 0xa76   : > { %1764 = shalt.err (!%p1761_p2)
}
 0xa77   : > { %s1765_s12 = scalar_lea.hbm %s2145_s7, 128  ;;  %s1769_s29 = scalar_lea.hbm %s2195_s5, 256 }
 0xa78   : > { %p1766_p13 = scmp.ne.s32.totalorder %s2145_s7, %s1765_s12  ;;  %p1770_p4 = scmp.lt.u32.totalorder %s2145_s7, %s2195_s5 }
 0xa79   : > { %p1771_p5 = scmp.lt.u32.totalorder %s1769_s29, %s1765_s12  ;;  %p1773_p11 = scmp.lt.u32.totalorder %s1765_s12, %s2145_s7 }
 0xa7a   : > { %p1767_p6 = pnand %p1766_p13, %p2209_p0 }
 0xa7b   : > { %p1772_p8 = por %p1771_p5, %p1770_p4 }
 0xa7c   : > { %p1768_p10 = pneg %p1767_p6 }
 0xa7d   : > { %p1774_p1 = por %p1773_p11, %p1772_p8 }
 0xa7f   : > { %p1775_p3 = pnand %p1774_p1, %p1768_p10 }
 0xa81   : > { %1778 = shalt.err (!%p1775_p3)
}
 0xa82   : > { %1576 = dma.vmem_to_hbm [thread:$0]  (%p2209_p0), %s2147_s10, 128, %s2145_s7, %s1323_s6  }
 0xa83 PF: > { %s1348_s26 = sand.u32 1, %s1809_s18   ;;  %p2210_p7 = scmp.ne.s32.totalorder %s2200_s25, 0 }
 0xa84   : > { %p2211_p9 = scmp.ge.s32.totalorder %s1821_s21, 2  ;;  %s1349_s8 = scalar_lea.sflag [#allocation4], %s1348_s26 }
 0xa86   : > { %p1590_p12 = pnand %p2211_p9, %p2210_p7 }
 0xa88   : > { %1804 = dma.done.wait (!%p1590_p12), %s1349_s8, 128  }
 0xa89   : > { %1806 = vsyncadd (!%p1590_p12), %s1349_s8, 4294967168  ;;  %p19_p2 = scmp.ge.s32.totalorder %s1983_s14, 4   ;;  %s2212_s18 = smov %s1813_s19 }
 0xa8a   : > { %s2213_s19 = smov %s1817_s20  ;;  %s2214_s20 = smov %s1999_s27 }
 0xa8b   : > { %s2215_s21 = smov %s1983_s14  ;;  %21 = sbr.rel (!%p19_p2) target bundleno = 6 (0x6), region = 93 }
 0xa92   :  { %1354 = vsyncpa [#allocation3], 1 }
 0xa93   :  { %1356 = vsyncpa [#allocation3 + $0x1], 1 }
 0xa94   :  { %1357 = vsyncpa [#allocation6], 1 }
 0xa95   :  { %1358 = vsyncpa [#allocation4], 1 }
 0xa96   :  { %1360 = vsyncpa [#allocation4 + $0x1], 1 }

</bundles_post_ra>
